<compile_context>
chip_gen: v7x
topology: tpu7x:2x2x1
jax: 0.10.0
libtpu: 0.0.40
codegen_flags: <defaults>
</compile_context>

<pallas_src>
import functools

import jax
import jax.numpy as jnp
from jax import lax
from jax.experimental import pallas as pl
from jax.experimental.pallas import tpu as pltpu


def _round_up(x, m):
    return (x + m - 1) // m * m


def _dense_block_kernel(x_ref,
                        w1_ref, b1_ref,
                        w2_ref, b2_ref,
                        w3_ref, b3_ref,
                        w4_ref, b4_ref,
                        o_ref,
                        *, chunk, compute_dtype):
    """Fused forward: x -> lrelu(conv1) -> lrelu(conv2) -> lrelu(conv3) -> conv4.

    x_ref: (C_in, tm) pixel tile (pixels on lanes); o_ref: (C_in, tm).
    Weights are (c_out, c_in), biases (c_out, 1): tiny full arrays in VMEM.
    """
    tm = x_ref.shape[-1]
    n_chunks = tm // chunk
    cd = compute_dtype

    # Hoisted once per grid step (NOT per chunk): weight/bias loads + casts.
    w1 = w1_ref[...].astype(cd); b1 = b1_ref[...]
    w2 = w2_ref[...].astype(cd); b2 = b2_ref[...]
    w3 = w3_ref[...].astype(cd); b3 = b3_ref[...]
    w4 = w4_ref[...].astype(cd); b4 = b4_ref[...]

    def layer(w, b, h, act):
        # Channel contraction on the MXU; f32 accumulation.  HIGHEST keeps the
        # f32 path near-exact so the 1e-5 check vs the f32 reference holds.
        z = jnp.dot(w, h.astype(cd),
                    preferred_element_type=jnp.float32,
                    precision=lax.Precision.HIGHEST) + b
        # max-form LeakyReLU(0.2): 2 VALU ops instead of cmp+mul+select.
        return jnp.maximum(z, 0.2 * z) if act else z

    # Static (fully unrolled) inner loop over lane sub-chunks: big DMA tile,
    # small live activation footprint per chunk.
    for c in range(n_chunks):
        sl = pl.ds(c * chunk, chunk)
        h = layer(w1, b1, x_ref[:, sl], True)
        h = layer(w2, b2, h, True)
        h = layer(w3, b3, h, True)
        h = layer(w4, b4, h, False)          # conv4: no activation
        o_ref[:, sl] = h.astype(o_ref.dtype)


def _choose_tiles(HW, N, tm_max):
    """Pick (tm, chunk): 128-aligned DMA tile + inner compute chunk size."""
    tm = min(_round_up(tm_max, 128), _round_up(HW, 128))
    # Megacore balance (v7x: 2 TCs): keep >= ~4 total grid steps when the image
    # allows, so each core gets >= 2 steps and DMA double-buffers behind compute.
    while N * ((HW + tm - 1) // tm) < 4 and tm > 128:
        tm = _round_up(tm // 2, 128)
    for chunk in (512, 256, 128):
        if tm % chunk == 0:
            return tm, chunk
    return tm, tm


def dense_block_1x1(x_nchw, params, *, tm=8192, compute_dtype=jnp.float32):
    """Apply DenseBlock1X1 forward.  x_nchw: (N, C_in, H, W).

    compute_dtype=jnp.bfloat16 is an optional v6e/v7x fast path (f32 accumulate);
    default f32 matches the reference exactly.  Keep f32 on v5e.
    """
    (w1, b1), (w2, b2), (w3, b3), (w4, b4) = params
    N, C, H, W = x_nchw.shape
    HW = H * W

    # NCHW viewed as (N, C, HW): free reshape — no transpose, no pad, no slice.
    x3 = x_nchw.reshape(N, C, HW)

    # Kernel wants (out, in) weights and (out, 1) biases (tiny, one-time prep).
    def prep(w, b):
        return w.T.astype(jnp.float32), b.reshape(-1, 1).astype(jnp.float32)

    w1t, b1t = prep(w1, b1)
    w2t, b2t = prep(w2, b2)
    w3t, b3t = prep(w3, b3)
    w4t, b4t = prep(w4, b4)

    c1 = w1t.shape[1]       # C_in
    c2 = w1t.shape[0]       # 2*C_in
    c_out = w4t.shape[0]    # C_in

    tm, chunk = _choose_tiles(HW, N, tm)
    # Partial trailing pixel block (HW % tm != 0) is handled by Pallas:
    # padded reads, masked trailing writes — no extra HBM passes.
    grid = (N, pl.cdiv(HW, tm))

    def full(shape):
        # Constant block index => weights/biases stay resident in VMEM.
        return pl.BlockSpec(shape, lambda n, i: (0, 0))

    kernel = functools.partial(_dense_block_kernel,
                               chunk=chunk, compute_dtype=compute_dtype)

    out3 = pl.pallas_call(
        kernel,
        out_shape=jax.ShapeDtypeStruct((N, c_out, HW), x_nchw.dtype),
        grid_spec=pltpu.PrefetchScalarGridSpec(
            num_scalar_prefetch=0,
            grid=grid,
            in_specs=[
                # Batch dim squeezed; kernel sees (C_in, tm).
                pl.BlockSpec((None, c1, tm), lambda n, i: (n, 0, i)),
                full((c2, c1)), full((c2, 1)),        # conv1 w, b
                full((c2, c2)), full((c2, 1)),        # conv2 w, b
                full((c2, c2)), full((c2, 1)),        # conv3 w, b
                full((c_out, c2)), full((c_out, 1)),  # conv4 w, b
            ],
            out_specs=pl.BlockSpec((None, c_out, tm), lambda n, i: (n, 0, i)),
        ),
        compiler_params=pltpu.CompilerParams(
            dimension_semantics=("parallel", "parallel")),
    )(x3, w1t, b1t, w2t, b2t, w3t, b3t, w4t, b4t)

    return out3.reshape(N, c_out, H, W)


def init_params(key, channel_in):
    """Deterministic xavier-normal-like init scaled by 0.1 (as in mutil)."""
    c1 = channel_in
    c2 = 2 * channel_in
    dims = [(c1, c2), (c2, c2), (c2, c2), (c2, c1)]
    params = []
    for i, (fi, fo) in enumerate(dims):
        kw, kb = jax.random.split(jax.random.fold_in(key, i))
        std = 0.1 * jnp.sqrt(2.0 / (fi + fo))   # xavier_normal * 0.1
        # Stored as (in, out): equivalent to PyTorch conv weight (out, in, 1, 1)^T.
        w = std * jax.random.normal(kw, (fi, fo), dtype=jnp.float32)
        b = 0.01 * jax.random.normal(kb, (1, fo), dtype=jnp.float32)
        params.append((w, b))
    return params


def _reference(x_nchw, params):
    """Pure-JAX reference of the same forward pass."""
    (w1, b1), (w2, b2), (w3, b3), (w4, b4) = params
    N, C, H, W = x_nchw.shape
    x = jnp.transpose(x_nchw, (0, 2, 3, 1)).reshape(-1, C)

    def lrelu(v):
        return jnp.where(v > 0, v, 0.2 * v)

    h = lrelu(x @ w1 + b1)
    h = lrelu(h @ w2 + b2)
    h = lrelu(h @ w3 + b3)
    h = h @ w4 + b4
    return jnp.transpose(h.reshape(N, H, W, -1), (0, 3, 1, 2))


if __name__ == "__main__":
    key = jax.random.PRNGKey(0)
    k_x, k_p = jax.random.split(key)

    N, C_in, H, W = 2, 4, 16, 16         # small shapes consistent with the module
    x = jax.random.normal(k_x, (N, C_in, H, W), dtype=jnp.float32)
    params = init_params(k_p, C_in)

    out = dense_block_1x1(x, params)
    out = jax.block_until_ready(out)

    ref = _reference(x, params)
    assert out.shape == (N, C_in, H, W)
    assert jnp.allclose(out, ref, atol=1e-5, rtol=1e-5)

    print("KERNEL_OK")
</pallas_src>

<mosaic_0001>
module attributes {stable_mosaic.version = 11 : i64} {
  func.func @_dense_block_kernel(%arg0: i32, %arg1: i32, %arg2: memref<1x4x128xf32, #tpu.memory_space<vmem>>, %arg3: memref<8x4xf32, #tpu.memory_space<vmem>>, %arg4: memref<8x1xf32, #tpu.memory_space<vmem>>, %arg5: memref<8x8xf32, #tpu.memory_space<vmem>>, %arg6: memref<8x1xf32, #tpu.memory_space<vmem>>, %arg7: memref<8x8xf32, #tpu.memory_space<vmem>>, %arg8: memref<8x1xf32, #tpu.memory_space<vmem>>, %arg9: memref<4x8xf32, #tpu.memory_space<vmem>>, %arg10: memref<4x1xf32, #tpu.memory_space<vmem>>, %arg11: memref<1x4x128xf32, #tpu.memory_space<vmem>>) attributes {dimension_semantics = [#tpu.dimension_semantics<parallel>, #tpu.dimension_semantics<parallel>], iteration_bounds = array<i64: 2, 2>, scalar_prefetch = 0 : i64, scratch_operands = 0 : i64, tpu.core_type = #tpu.core_type<tc>, window_params = [{transform_indices = @transform_0, window_bounds = array<i64: 1, 4, 128>}, {pipeline_mode = #tpu.pipeline_mode<synchronous>, transform_indices = @transform_1, window_bounds = array<i64: 8, 4>}, {pipeline_mode = #tpu.pipeline_mode<synchronous>, transform_indices = @transform_2, window_bounds = array<i64: 8, 1>}, {pipeline_mode = #tpu.pipeline_mode<synchronous>, transform_indices = @transform_3, window_bounds = array<i64: 8, 8>}, {pipeline_mode = #tpu.pipeline_mode<synchronous>, transform_indices = @transform_4, window_bounds = array<i64: 8, 1>}, {pipeline_mode = #tpu.pipeline_mode<synchronous>, transform_indices = @transform_5, window_bounds = array<i64: 8, 8>}, {pipeline_mode = #tpu.pipeline_mode<synchronous>, transform_indices = @transform_6, window_bounds = array<i64: 8, 1>}, {pipeline_mode = #tpu.pipeline_mode<synchronous>, transform_indices = @transform_7, window_bounds = array<i64: 4, 8>}, {pipeline_mode = #tpu.pipeline_mode<synchronous>, transform_indices = @transform_8, window_bounds = array<i64: 4, 1>}, {transform_indices = @transform_9, window_bounds = array<i64: 1, 4, 128>}]} {
    %c0 = arith.constant 0 : index
    %c0_0 = arith.constant 0 : index
    %0 = vector.load %arg3[%c0, %c0_0] : memref<8x4xf32, #tpu.memory_space<vmem>>, vector<8x4xf32>
    %c0_1 = arith.constant 0 : index
    %c0_2 = arith.constant 0 : index
    %1 = vector.load %arg4[%c0_1, %c0_2] : memref<8x1xf32, #tpu.memory_space<vmem>>, vector<8x1xf32>
    %c0_3 = arith.constant 0 : index
    %c0_4 = arith.constant 0 : index
    %2 = vector.load %arg5[%c0_3, %c0_4] : memref<8x8xf32, #tpu.memory_space<vmem>>, vector<8x8xf32>
    %c0_5 = arith.constant 0 : index
    %c0_6 = arith.constant 0 : index
    %3 = vector.load %arg6[%c0_5, %c0_6] : memref<8x1xf32, #tpu.memory_space<vmem>>, vector<8x1xf32>
    %c0_7 = arith.constant 0 : index
    %c0_8 = arith.constant 0 : index
    %4 = vector.load %arg7[%c0_7, %c0_8] : memref<8x8xf32, #tpu.memory_space<vmem>>, vector<8x8xf32>
    %c0_9 = arith.constant 0 : index
    %c0_10 = arith.constant 0 : index
    %5 = vector.load %arg8[%c0_9, %c0_10] : memref<8x1xf32, #tpu.memory_space<vmem>>, vector<8x1xf32>
    %c0_11 = arith.constant 0 : index
    %c0_12 = arith.constant 0 : index
    %6 = vector.load %arg9[%c0_11, %c0_12] : memref<4x8xf32, #tpu.memory_space<vmem>>, vector<4x8xf32>
    %c0_13 = arith.constant 0 : index
    %c0_14 = arith.constant 0 : index
    %7 = vector.load %arg10[%c0_13, %c0_14] : memref<4x1xf32, #tpu.memory_space<vmem>>, vector<4x1xf32>
    %c0_15 = arith.constant 0 : index
    %c0_16 = arith.constant 0 : index
    %c0_17 = arith.constant 0 : index
    %8 = vector.load %arg2[%c0_15, %c0_16, %c0_17] : memref<1x4x128xf32, #tpu.memory_space<vmem>>, vector<1x4x128xf32>
    %9 = vector.shape_cast %8 : vector<1x4x128xf32> to vector<4x128xf32>
    %cst = arith.constant dense<0.000000e+00> : vector<8x128xf32>
    %10 = tpu.matmul %0, %9, %cst {dimension_numbers = #tpu.dot_dimension_numbers<[1], [0], [0], [1], [0, 0, 1, 1], [], []>, precision = #tpu.contract_precision<fp32>} : vector<8x4xf32>, vector<4x128xf32>, vector<8x128xf32> -> vector<8x128xf32>
    %11 = vector.broadcast %1 : vector<8x1xf32> to vector<8x128xf32>
    %12 = arith.addf %10, %11 : vector<8x128xf32>
    %cst_18 = arith.constant 2.000000e-01 : f32
    %13 = vector.broadcast %cst_18 : f32 to vector<8x128xf32>
    %14 = arith.mulf %13, %12 : vector<8x128xf32>
    %15 = arith.maximumf %12, %14 : vector<8x128xf32>
    %cst_19 = arith.constant dense<0.000000e+00> : vector<8x128xf32>
    %16 = tpu.matmul %2, %15, %cst_19 {dimension_numbers = #tpu.dot_dimension_numbers<[1], [0], [0], [1], [0, 0, 1, 1], [], []>, precision = #tpu.contract_precision<fp32>} : vector<8x8xf32>, vector<8x128xf32>, vector<8x128xf32> -> vector<8x128xf32>
    %17 = vector.broadcast %3 : vector<8x1xf32> to vector<8x128xf32>
    %18 = arith.addf %16, %17 : vector<8x128xf32>
    %cst_20 = arith.constant 2.000000e-01 : f32
    %19 = vector.broadcast %cst_20 : f32 to vector<8x128xf32>
    %20 = arith.mulf %19, %18 : vector<8x128xf32>
    %21 = arith.maximumf %18, %20 : vector<8x128xf32>
    %cst_21 = arith.constant dense<0.000000e+00> : vector<8x128xf32>
    %22 = tpu.matmul %4, %21, %cst_21 {dimension_numbers = #tpu.dot_dimension_numbers<[1], [0], [0], [1], [0, 0, 1, 1], [], []>, precision = #tpu.contract_precision<fp32>} : vector<8x8xf32>, vector<8x128xf32>, vector<8x128xf32> -> vector<8x128xf32>
    %23 = vector.broadcast %5 : vector<8x1xf32> to vector<8x128xf32>
    %24 = arith.addf %22, %23 : vector<8x128xf32>
    %cst_22 = arith.constant 2.000000e-01 : f32
    %25 = vector.broadcast %cst_22 : f32 to vector<8x128xf32>
    %26 = arith.mulf %25, %24 : vector<8x128xf32>
    %27 = arith.maximumf %24, %26 : vector<8x128xf32>
    %cst_23 = arith.constant dense<0.000000e+00> : vector<4x128xf32>
    %28 = tpu.matmul %6, %27, %cst_23 {dimension_numbers = #tpu.dot_dimension_numbers<[1], [0], [0], [1], [0, 0, 1, 1], [], []>, precision = #tpu.contract_precision<fp32>} : vector<4x8xf32>, vector<8x128xf32>, vector<4x128xf32> -> vector<4x128xf32>
    %29 = vector.broadcast %7 : vector<4x1xf32> to vector<4x128xf32>
    %30 = arith.addf %28, %29 : vector<4x128xf32>
    %c0_24 = arith.constant 0 : index
    %c0_25 = arith.constant 0 : index
    %c0_26 = arith.constant 0 : index
    %31 = vector.load %arg11[%c0_24, %c0_25, %c0_26] : memref<1x4x128xf32, #tpu.memory_space<vmem>>, vector<1x4x128xf32>
    %32 = vector.shape_cast %31 : vector<1x4x128xf32> to vector<4x128xf32>
    %33 = vector.shape_cast %30 : vector<4x128xf32> to vector<1x4x128xf32>
    tpu.vector_store %arg11[%c0_24, %c0_25, %c0_26], %33 {strides = array<i32>} : memref<1x4x128xf32, #tpu.memory_space<vmem>>, vector<1x4x128xf32>,
    return
  }
  func.func @transform_0(%arg0: i32, %arg1: i32) -> (i32, i32, i32) {
    %c0_i32 = arith.constant 0 : i32
    %c0_i32_0 = arith.constant 0 : i32
    return %arg0, %c0_i32, %arg1 : i32, i32, i32
  }
  func.func @transform_1(%arg0: i32, %arg1: i32) -> (i32, i32) {
    %c0_i32 = arith.constant 0 : i32
    %c0_i32_0 = arith.constant 0 : i32
    %c0_i32_1 = arith.constant 0 : i32
    return %c0_i32, %c0_i32_0 : i32, i32
  }
  func.func @transform_2(%arg0: i32, %arg1: i32) -> (i32, i32) {
    %c0_i32 = arith.constant 0 : i32
    %c0_i32_0 = arith.constant 0 : i32
    %c0_i32_1 = arith.constant 0 : i32
    return %c0_i32, %c0_i32_0 : i32, i32
  }
  func.func @transform_3(%arg0: i32, %arg1: i32) -> (i32, i32) {
    %c0_i32 = arith.constant 0 : i32
    %c0_i32_0 = arith.constant 0 : i32
    %c0_i32_1 = arith.constant 0 : i32
    return %c0_i32, %c0_i32_0 : i32, i32
  }
  func.func @transform_4(%arg0: i32, %arg1: i32) -> (i32, i32) {
    %c0_i32 = arith.constant 0 : i32
    %c0_i32_0 = arith.constant 0 : i32
    %c0_i32_1 = arith.constant 0 : i32
    return %c0_i32, %c0_i32_0 : i32, i32
  }
  func.func @transform_5(%arg0: i32, %arg1: i32) -> (i32, i32) {
    %c0_i32 = arith.constant 0 : i32
    %c0_i32_0 = arith.constant 0 : i32
    %c0_i32_1 = arith.constant 0 : i32
    return %c0_i32, %c0_i32_0 : i32, i32
  }
  func.func @transform_6(%arg0: i32, %arg1: i32) -> (i32, i32) {
    %c0_i32 = arith.constant 0 : i32
    %c0_i32_0 = arith.constant 0 : i32
    %c0_i32_1 = arith.constant 0 : i32
    return %c0_i32, %c0_i32_0 : i32, i32
  }
  func.func @transform_7(%arg0: i32, %arg1: i32) -> (i32, i32) {
    %c0_i32 = arith.constant 0 : i32
    %c0_i32_0 = arith.constant 0 : i32
    %c0_i32_1 = arith.constant 0 : i32
    return %c0_i32, %c0_i32_0 : i32, i32
  }
  func.func @transform_8(%arg0: i32, %arg1: i32) -> (i32, i32) {
    %c0_i32 = arith.constant 0 : i32
    %c0_i32_0 = arith.constant 0 : i32
    %c0_i32_1 = arith.constant 0 : i32
    return %c0_i32, %c0_i32_0 : i32, i32
  }
  func.func @transform_9(%arg0: i32, %arg1: i32) -> (i32, i32, i32) {
    %c0_i32 = arith.constant 0 : i32
    %c0_i32_0 = arith.constant 0 : i32
    return %arg0, %c0_i32, %arg1 : i32, i32, i32
  }
}

</mosaic_0001>

<bundles_post_ra>
// kernel: tpu_custom_call.1
= control target key start
LH: loop header
LB: loop body
LE: loop exit
PB: predicated region body
PF: predicated region fallthrough
CT: control target
= control target key end

     0   :  { %s2975_s0 = inlined_call_operand.vmem [shape: f32[2,4,256], index: 0, kind: input, shape index: {}]   ;;  %s2976_s1 = inlined_call_operand.vmem [shape: f32[8,4], index: 1, kind: input, shape index: {}]   ;;  %s2977_s2 = inlined_call_operand.vmem [shape: f32[8,1], index: 2, kind: input, shape index: {}]   ;;  %s2978_s3 = inlined_call_operand.vmem [shape: f32[8,8], index: 3, kind: input, shape index: {}]   ;;  %s2979_s4 = inlined_call_operand.vmem [shape: f32[8,1], index: 4, kind: input, shape index: {}]   ;;  %s2980_s5 = inlined_call_operand.vmem [shape: f32[8,8], index: 5, kind: input, shape index: {}]   ;;  %s2981_s6 = inlined_call_operand.vmem [shape: f32[8,1], index: 6, kind: input, shape index: {}]   ;;  %s2982_s7 = inlined_call_operand.vmem [shape: f32[4,8], index: 7, kind: input, shape index: {}]   ;;  %s2983_s8 = inlined_call_operand.vmem [shape: f32[4,1], index: 8, kind: input, shape index: {}]   ;;  %s2984_s9 = inlined_call_operand.hbm [shape: f32[2,4,256], index: 9, kind: output, shape index: {}]  }
   0x1   :  { %2985 = sst [smem:[#allocation5_spill]] %s2976_s1 }
   0x2   :  { %2986 = sst [smem:[#allocation6_spill]] %s2977_s2 }
   0x3   :  { %14 = vsyncpa [#allocation3], 0 }
   0x4   :  { %16 = vsyncpa [#allocation3 + $0x1], 0  ;;  %s2739_s30 = smov 0   ;;  %s2741_s10 = smov 0  }
   0x5   :  { %s2743_s11 = smov 0   ;;  %s2745_s12 = smov 0  }
   0x6   :  { %s2747_s13 = smov 0   ;;  %s2749_s14 = smov 0  }
   0x7   :  { %s2751_s15 = smov 0   ;;  %s2753_s16 = smov 0  }
   0x8 LB: > { %s2288_s17 = sadd.s32 4294967295, %s2683_s16   ;;  %s2289_s18 = sadd.s32 4294967294, %s2683_s16   ;;  %s2683_s16 = sphi %s2753_s16, %s22_s16   ;;  %s2679_s15 = sphi %s2751_s15, %s2997_s15   ;;  %s2675_s14 = sphi %s2749_s14, %s2996_s14   ;;  %s2671_s13 = sphi %s2747_s13, %s2995_s13   ;;  %s2667_s12 = sphi %s2745_s12, %s2994_s12   ;;  %s2663_s11 = sphi %s2743_s11, %s2993_s11   ;;  %s2659_s10 = sphi %s2741_s10, %s2992_s10   ;;  %s2655_s30 = sphi %s2739_s30, %s2991_s30  }
   0x9   : > { %s31_s19 = sadd.s32 1, %s2675_s14  ;;  %s34_s20 = sadd.s32 1, %s2679_s15 }
   0xa   : > { %p32_p0 = scmp.ge.s32.totalorder %s31_s19, 2  ;;  %p249_p1 = scmp.ne.s32.totalorder %s2663_s11, %s2659_s10 }
   0xb   : > { %p250_p2 = scmp.eq.s32.totalorder %s2288_s17, 3  ;;  %p255_p5 = scmp.ne.s32.totalorder %s2659_s10, %s2655_s30 }
   0xc   : > { %s2999_s19 = smov (%p32_p0, %s31_s19), 0  ;;  %s3001_s20 = smov (!%p32_p0, %s34_s20), %s2679_s15 }
   0xd   : > { %s235_s21 = ssub.s32 %s2675_s14, %s2999_s19  ;;  %p2790_p3 = por %p250_p2, %p249_p1 }
   0xe   : > { %p36_p4 = scmp.ge.s32.totalorder %s3001_s20, 2  ;;  %p256_p6 = scmp.eq.s32.totalorder %s2289_s18, 3 }
   0xf   : > { %p2292_p7 = scmp.ge.s32.totalorder %s2683_s16, 1  ;;  %p309_p9 = scmp.lt.s32.totalorder %s2683_s16, 5 }
  0x10   : > { %s3003_s20 = smov (%p36_p4, %s3001_s20), 0  ;;  %p2799_p8 = por %p256_p6, %p255_p5 }
  0x11   : > { %s234_s24 = ssub.s32 %s2679_s15, %s3003_s20  ;;  %s239_s25 = sadd.s32 1, %s2663_s11 }
  0x12   : > { %s236_s26 = sor.u32 %s235_s21, %s234_s24  ;;  %p310_p10 = pnand %p2292_p7, %p309_p9 }
  0x13   : > { %p237_p11 = scmp.eq.s32.totalorder %s236_s26, 0  ;;  %p348_p12 = scmp.lt.s32.totalorder (!%p310_p10), %s2671_s13, 1  ;;  %v2685_v1 = vmov (!%p310_p10), 0.0   ;;  %vm2686_vm0 = vmmov (!%p310_p10), 0   ;;  %vm370_vm1 = vcmask (!%p310_p10), 31744   ;;  %v2687_v4 = vmov (!%p310_p10), 0  }
  0x14   : > { %313 = sbr.rel (%p310_p10) target bundleno = 1091 (0x443), region = 56  ;;  %p350_p13 = scmp.lt.s32.totalorder (!%p310_p10), %s2667_s12, 1  ;;  %2349 = vmatprep.subr.mxu0 (!%p310_p10), %v2685_v1  ;;  %2351 = vmatprep.mubr.msk.f32.mxu0 (!%p310_p10), %vm2686_vm0, %v2685_v1  ;;  %v359_v6 = vld [vmem:[%s2979_s4] sm:$0xff] (!%p310_p10)  ;;  %vm374_vm2 = vcmask (!%p310_p10), 1043456   ;;  %vm831_vm3 = vcmask (!%p310_p10), 64512  }
  0x15   : > { %s2808_s27 = scalar_select %p237_p11, %s2663_s11, %s239_s25  }
  0x16   : > { %s2989_s1 = sld [smem:[#allocation5_spill]] (!%p310_p10)  ;;  %s2990_s2 = sld [smem:[#allocation6_spill]] (!%p310_p10)  ;;  %2587 = vset.pattern.permute.xlu0 (!%p310_p10), %v2687_v4  ;;  %2379 = vmatprep.subr.mxu1 (!%p310_p10), %v2685_v1  ;;  %v358_v18 = vld [vmem:[%s2978_s3] sm:$0xff] (!%p310_p10) }
  0x17   : > { %2381 = vmatprep.mubr.msk.f32.mxu1 (!%p310_p10), %vm2686_vm0, %v2685_v1  ;;  %2588 = vset.pattern.permute.xlu1 (!%p310_p10), %v2687_v4  ;;  %v833_v19 = vsel (!%p310_p10), %vm831_vm3, %v358_v18, 0  ;;  %v361_v36 = vld [vmem:[%s2981_s6] sm:$0xff] (!%p310_p10) }
  0x18   : > { %v901_v20 = vand.u32 (!%p310_p10), 4294901760, %v833_v19  ;;  %1285 = vperm.xlu1 (!%p310_p10), %2588, %v361_v36   ;;  %v363_v37 = vld [vmem:[%s2983_s8] sm:$0xf] (!%p310_p10) }
  0x19   : > { %v360_v38 = vld [vmem:[%s2980_s5] sm:$0xff] (!%p310_p10) }
  0x1a   : > { %v902_v21 = vsub.f32 (!%p310_p10), %v833_v19, %v901_v20  ;;  %v1289_v39 = vsel (!%p310_p10), %vm831_vm3, %v360_v38, 0  ;;  %v362_v56 = vld [vmem:[%s2982_s7] sm:$0xf] (!%p310_p10) }
  0x1b   : > { %s349_s21 = scalar_select %p348_p12, %s2671_s13, 1  ;;  %v1357_v40 = vand.u32 4294901760, %v1289_v39  ;;  %v1745_v57 = vsel %vm831_vm3, %v362_v56, 0 }
  0x1c   : > { %v356_v0 = vld [vmem:[%s2989_s1] sm:$0xff]  ;;  %s351_s24 = scalar_select %p350_p13, %s2667_s12, 1  ;;  %v903_v22 = vand.u32 4294901760, %v902_v21  ;;  %1741 = vperm.xlu1 %2588, %v363_v37   ;;  %v1813_v58 = vand.u32 4294901760, %v1745_v57 }
  0x1d   : > { %v357_v2 = vld [vmem:[%s2990_s2] sm:$0xff]  ;;  %v372_v3 = vsel %vm370_vm1, %v356_v0, 0  ;;  %s2294_s25 = sshll.u32 %s349_s21, 1  ;;  %v1358_v41 = vsub.f32 %v1289_v39, %v1357_v40  ;;  %s345_s1 = sand.u32 1, %s2659_s10  }
  0x1e   : > { %v444_v5 = vand.u32 4294901760, %v372_v3  ;;  %367 = vperm.xlu0 %2587, %v357_v2   ;;  %s353_s29 = sadd.s32 %s2294_s25, %s351_s24  ;;  %v904_v27 = vsub.f32 %v902_v21, %v903_v22  ;;  %v1814_v59 = vsub.f32 %v1745_v57, %v1813_v58  ;;  %s2297_s21 = sshll.u32 %s2671_s13, 1 }
  0x1f   : > { %s2295_s17 = sshll.u32 %s353_s29, 2  ;;  %v1359_v42 = vand.u32 4294901760, %v1358_v41  ;;  %s2206_s24 = sadd.s32 %s2667_s12, %s2297_s21 }
  0x20   : > { %v445_v7 = vsub.f32 %v372_v3, %v444_v5  ;;  %s355_s2 = scalar_lea.vmem %s2975_s0, %s2295_s17  ;;  %v905_v30 = vand.u32 4294901760, %v904_v27  ;;  %v1815_v60 = vand.u32 4294901760, %v1814_v59  ;;  %s2298_s25 = sshll.u32 %s2206_s24, 6 }
  0x21   : > { %v364_v9 = vld [vmem:[%s355_s2] sm:$0xf]  ;;  %v1360_v47 = vsub.f32 %v1358_v41, %v1359_v42  ;;  %s2293_s2 = sshll.u32 %s345_s1, 2  ;;  %s2922_s18 = scalar_lea.hbm %s2984_s9, %s2298_s25 }
  0x22   : > { %v446_v8 = vand.u32 4294901760, %v445_v7  ;;  %828 = vperm.xlu0 %2587, %v359_v6   ;;  %v376_v10 = vsel %vm374_vm2, %v364_v9, 0  ;;  %v1816_v2 = vsub.f32 %v1814_v59, %v1815_v60  ;;  %s347_s26 = scalar_lea.vmem [#allocation2], %s2293_s2  ;;  %s2195_s13 = scalar_lea.sflag [#allocation3], %s345_s1 }
  0x23   : > { %v379_v12 = vand.u32 4294901760, %v376_v10  ;;  %v1361_v50 = vand.u32 4294901760, %v1360_v47  ;;  %s2210_s28 = sshll.u32 %s347_s26, 4  ;;  %s2688_s2 = smov [#allocation2]   ;;  %s2924_s28 = int_to_ptr.vmem [resolvable:$true] %s2210_s28 }
  0x24   : > { %v447_v11 = vsub.f32 %v445_v7, %v446_v8  ;;  %s2589_s12 = scalar_lea.vmem %s2924_s28, 64  ;;  %s2593_s21 = sshll.u32 %s2688_s2, 4  ;;  %s2594_s21 = int_to_ptr.vmem [resolvable:$false] %s2593_s21 }
  0x25   : > { %2350 = vmatpush3.msra.mxu0 %v379_v12  ;;  %v456_v14 = vsub.f32 %v376_v10, %v379_v12  ;;  %p2590_p0 = scmp.ne.s32.totalorder %s2924_s28, %s2589_s12  ;;  %s2595_s24 = scalar_lea.vmem %s2594_s21, 128 }
  0x26   : > { %v448_v13 = vand.u32 4294901760, %v447_v11  ;;  %2354 = vmatprep.subr.mxu0 %v2685_v1  ;;  %p2596_p4 = scmp.lt.s32.totalorder %s2924_s28, %s2594_s21  ;;  %p2597_p5 = scmp.lt.s32.totalorder %s2595_s24, %s2589_s12 }
  0x27   : > { %v457_v15 = vand.u32 4294901760, %v456_v14  ;;  %p2591_p1 = pnand %p2590_p0, %p2790_p3 }
  0x28   : > { %2352 = vmatmul.mubr.f32.vlgmr.msra.gmra.mrb[0].mxu0 %v448_v13  ;;  %p2598_p6 = por %p2597_p5, %p2596_p4 }
  0x29   : > { %2356 = vmatprep.mubr.msk.f32.mxu0 %vm2686_vm0, %v2685_v1  ;;  %v458_v16 = vsub.f32 %v456_v14, %v457_v15  ;;  %p2592_p2 = pneg %p2591_p1 }
  0x2b   : > { %v459_v17 = vand.u32 4294901760, %v458_v16  ;;  %p2599_p7 = pnand %p2598_p6, %p2592_p2 }
  0x2d   : > { %2355 = vmatpush3.msra.mxu0 %v459_v17 }
  0x2e   : > { %2359 = vmatprep.subr.mxu0 %v2685_v1 }
  0x30   : > { %2357 = vmatmul.mubr.f32.vlgmr.msra.gmra.mrb[0].mxu0 %v444_v5 }
  0x31   : > { %2360 = vmatpush3.msra.mxu0 %v456_v14  ;;  %2361 = vmatprep.mubr.msk.f32.mxu0 %vm2686_vm0, %v2685_v1 }
  0x32   : > { %2364 = vmatprep.subr.mxu0 %v2685_v1 }
  0x38   : > { %2362 = vmatmul.mubr.f32.vlgmr.msra.gmra.mrb[0].mxu0 %v445_v7 }
  0x39   : > { %2365 = vmatpush3.msra.mxu0 %v379_v12  ;;  %2366 = vmatprep.mubr.msk.f32.mxu0 %vm2686_vm0, %v2685_v1 }
  0x3a   : > { %2369 = vmatprep.subr.mxu0 %v2685_v1 }
  0x40   : > { %2367 = vmatmul.mubr.f32.vlgmr.msra.gmra.mrb[0].mxu0 %v446_v8 }
  0x41   : > { %2370 = vmatpush3.msra.mxu0 %v457_v15  ;;  %2371 = vmatprep.mubr.msk.f32.mxu0 %vm2686_vm0, %v2685_v1 }
  0x42   : > { %2374 = vmatprep.subr.mxu0 %v2685_v1 }
  0x48   : > { %2372 = vmatmul.mubr.f32.vlgmr.msra.gmra.mrb[0].mxu0 %v444_v5 }
  0x49   : > { %2375 = vmatpush3.msra.mxu0 %v379_v12  ;;  %2376 = vmatprep.mubr.msk.f32.mxu0 %vm2686_vm0, %v2685_v1 }
  0x4a   : > { %2409 = vmatprep.subr.mxu0 %v2685_v1 }
  0x50   : > { %2377 = vmatmul.mubr.f32.vlgmr.msra.gmra.mrb[0].mxu0 %v444_v5  ;;  %v1817_v5 = vand.u32 4294901760, %v1816_v2 }
  0x51   : > { %2411 = vmatprep.mubr.msk.f32.mxu0 %vm2686_vm0, %v2685_v1 }
  0x97   : > { %v1286_v61 = vpop.permute.xlu1 %1285 }
  0x9b   : > { %v1742_v11 = vpop.permute.xlu1 %1741 }
  0x9d   : > { %v368_v23 = vpop.permute.xlu0 %367 }
  0xa1   : > { %v829_v43 = vpop.permute.xlu0 %828 }
 0x123   : > { %v820_v24 = vpop.f32.mrb[0].mxu0 }
 0x124   : > { %v2469_v25 = vadd.f32 %v820_v24, %v368_v23  ;;  %v2378_v26 = vpop.f32.mrb[1].mxu0 }
 0x126   : > { %v824_v28 = vmul.f32 0.2, %v2469_v25 }
 0x128   : > { %v825_v29 = vmax.f32 %v2469_v25, %v824_v28 }
 0x12a   : > { %v836_v31 = vand.u32 4294901760, %v825_v29 }
 0x12c   : > { %v913_v32 = vsub.f32 %v825_v29, %v836_v31  ;;  %2380 = vmatpush3.msra.mxu1 %v836_v31 }
 0x12d   : > { %2382 = vmatmul.mubr.f32.vlgmr.msra.gmra.mrb[0].mxu1 %v905_v30  ;;  %2384 = vmatprep.subr.mxu1 %v2685_v1 }
 0x12e   : > { %v914_v33 = vand.u32 4294901760, %v913_v32  ;;  %2386 = vmatprep.mubr.msk.f32.mxu1 %vm2686_vm0, %v2685_v1 }
 0x130   : > { %v915_v34 = vsub.f32 %v913_v32, %v914_v33 }
 0x132   : > { %v916_v35 = vand.u32 4294901760, %v915_v34 }
 0x134   : > { %2385 = vmatpush3.msra.mxu1 %v916_v35 }
 0x135   : > { %2387 = vmatmul.mubr.f32.vlgmr.msra.gmra.mrb[0].mxu1 %v901_v20  ;;  %2389 = vmatprep.subr.mxu1 %v2685_v1 }
 0x136   : > { %2390 = vmatpush3.msra.mxu1 %v913_v32  ;;  %2391 = vmatprep.mubr.msk.f32.mxu1 %vm2686_vm0, %v2685_v1 }
 0x137   : > { %2394 = vmatprep.subr.mxu1 %v2685_v1 }
 0x13d   : > { %2392 = vmatmul.mubr.f32.vlgmr.msra.gmra.mrb[0].mxu1 %v902_v21 }
 0x13e   : > { %2395 = vmatpush3.msra.mxu1 %v836_v31  ;;  %2396 = vmatprep.mubr.msk.f32.mxu1 %vm2686_vm0, %v2685_v1 }
 0x13f   : > { %2399 = vmatprep.subr.mxu1 %v2685_v1 }
 0x145   : > { %2397 = vmatmul.mubr.f32.vlgmr.msra.gmra.mrb[0].mxu1 %v903_v22 }
 0x146   : > { %2400 = vmatpush3.msra.mxu1 %v914_v33  ;;  %2401 = vmatprep.mubr.msk.f32.mxu1 %vm2686_vm0, %v2685_v1 }
 0x147   : > { %2404 = vmatprep.subr.mxu1 %v2685_v1 }
 0x14d   : > { %2402 = vmatmul.mubr.f32.vlgmr.msra.gmra.mrb[0].mxu1 %v901_v20 }
 0x14e   : > { %2405 = vmatpush3.msra.mxu1 %v836_v31  ;;  %2406 = vmatprep.mubr.msk.f32.mxu1 %vm2686_vm0, %v2685_v1 }
 0x14f   : > { %2439 = vmatprep.subr.mxu1 %v2685_v1 }
 0x155   : > { %2407 = vmatmul.mubr.f32.vlgmr.msra.gmra.mrb[0].mxu1 %v901_v20 }
 0x156   : > { %2441 = vmatprep.mubr.msk.f32.mxu1 %vm2686_vm0, %v2685_v1 }
 0x228   : > { %v1277_v44 = vpop.f32.mrb[0].mxu1 }
 0x229   : > { %v2470_v45 = vadd.f32 %v1277_v44, %v829_v43  ;;  %v2408_v46 = vpop.f32.mrb[1].mxu1 }
 0x22b   : > { %v1281_v48 = vmul.f32 0.2, %v2470_v45 }
 0x22d   : > { %v1282_v49 = vmax.f32 %v2470_v45, %v1281_v48 }
 0x22f   : > { %v1292_v51 = vand.u32 4294901760, %v1282_v49 }
 0x231   : > { %v1369_v52 = vsub.f32 %v1282_v49, %v1292_v51  ;;  %2410 = vmatpush3.msra.mxu0 %v1292_v51 }
 0x232   : > { %2412 = vmatmul.mubr.f32.vlgmr.msra.gmra.mrb[2].mxu0 %v1361_v50  ;;  %2414 = vmatprep.subr.mxu0 %v2685_v1 }
 0x233   : > { %v1370_v53 = vand.u32 4294901760, %v1369_v52  ;;  %2416 = vmatprep.mubr.msk.f32.mxu0 %vm2686_vm0, %v2685_v1 }
 0x235   : > { %v1371_v54 = vsub.f32 %v1369_v52, %v1370_v53 }
 0x237   : > { %v1372_v55 = vand.u32 4294901760, %v1371_v54 }
 0x239   : > { %2415 = vmatpush3.msra.mxu0 %v1372_v55 }
 0x23a   : > { %2417 = vmatmul.mubr.f32.vlgmr.msra.gmra.mrb[2].mxu0 %v1357_v40  ;;  %2419 = vmatprep.subr.mxu0 %v2685_v1 }
 0x23b   : > { %2420 = vmatpush3.msra.mxu0 %v1369_v52  ;;  %2421 = vmatprep.mubr.msk.f32.mxu0 %vm2686_vm0, %v2685_v1 }
 0x23c   : > { %2424 = vmatprep.subr.mxu0 %v2685_v1 }
 0x242   : > { %2422 = vmatmul.mubr.f32.vlgmr.msra.gmra.mrb[2].mxu0 %v1358_v41 }
 0x243   : > { %2425 = vmatpush3.msra.mxu0 %v1292_v51  ;;  %2426 = vmatprep.mubr.msk.f32.mxu0 %vm2686_vm0, %v2685_v1 }
 0x244   : > { %2429 = vmatprep.subr.mxu0 %v2685_v1 }
 0x24a   : > { %2427 = vmatmul.mubr.f32.vlgmr.msra.gmra.mrb[2].mxu0 %v1359_v42 }
 0x24b   : > { %2430 = vmatpush3.msra.mxu0 %v1370_v53  ;;  %2431 = vmatprep.mubr.msk.f32.mxu0 %vm2686_vm0, %v2685_v1 }
 0x24c   : > { %2434 = vmatprep.subr.mxu0 %v2685_v1 }
 0x252   : > { %2432 = vmatmul.mubr.f32.vlgmr.msra.gmra.mrb[2].mxu0 %v1357_v40 }
 0x253   : > { %2435 = vmatpush3.msra.mxu0 %v1292_v51  ;;  %2436 = vmatprep.mubr.msk.f32.mxu0 %vm2686_vm0, %v2685_v1 }
 0x25a   : > { %2437 = vmatmul.mubr.f32.vlgmr.msra.gmra.mrb[2].mxu0 %v1357_v40 }
 0x32d   : > { %v1733_v62 = vpop.f32.mrb[2].mxu0 }
 0x32e   : > { %v2471_v63 = vadd.f32 %v1733_v62, %v1286_v61  ;;  %v2438_v0 = vpop.f32.mrb[3].mxu0 }
 0x330   : > { %v1737_v3 = vmul.f32 0.2, %v2471_v63 }
 0x332   : > { %v1738_v4 = vmax.f32 %v2471_v63, %v1737_v3 }
 0x334   : > { %v1748_v6 = vand.u32 4294901760, %v1738_v4 }
 0x336   : > { %v1825_v7 = vsub.f32 %v1738_v4, %v1748_v6  ;;  %2440 = vmatpush3.msra.mxu1 %v1748_v6 }
 0x337   : > { %2442 = vmatmul.mubr.f32.vlgmr.msra.gmra.mrb[2].mxu1 %v1817_v5  ;;  %2444 = vmatprep.subr.mxu1 %v2685_v1 }
 0x338   : > { %v1826_v8 = vand.u32 4294901760, %v1825_v7  ;;  %2446 = vmatprep.mubr.msk.f32.mxu1 %vm2686_vm0, %v2685_v1 }
 0x33a   : > { %v1827_v9 = vsub.f32 %v1825_v7, %v1826_v8 }
 0x33c   : > { %v1828_v10 = vand.u32 4294901760, %v1827_v9 }
 0x33e   : > { %2445 = vmatpush3.msra.mxu1 %v1828_v10 }
 0x33f   : > { %2447 = vmatmul.mubr.f32.vlgmr.msra.gmra.mrb[2].mxu1 %v1813_v58  ;;  %2449 = vmatprep.subr.mxu1 %v2685_v1 }
 0x340   : > { %2450 = vmatpush3.msra.mxu1 %v1825_v7  ;;  %2451 = vmatprep.mubr.msk.f32.mxu1 %vm2686_vm0, %v2685_v1 }
 0x341   : > { %2454 = vmatprep.subr.mxu1 %v2685_v1 }
 0x347   : > { %2452 = vmatmul.mubr.f32.vlgmr.msra.gmra.mrb[2].mxu1 %v1814_v59 }
 0x348   : > { %2455 = vmatpush3.msra.mxu1 %v1748_v6  ;;  %2456 = vmatprep.mubr.msk.f32.mxu1 %vm2686_vm0, %v2685_v1 }
 0x349   : > { %2459 = vmatprep.subr.mxu1 %v2685_v1 }
 0x34f   : > { %2457 = vmatmul.mubr.f32.vlgmr.msra.gmra.mrb[2].mxu1 %v1815_v60 }
 0x350   : > { %2460 = vmatpush3.msra.mxu1 %v1826_v8  ;;  %2461 = vmatprep.mubr.msk.f32.mxu1 %vm2686_vm0, %v2685_v1 }
 0x351   : > { %2464 = vmatprep.subr.mxu1 %v2685_v1 }
 0x357   : > { %2462 = vmatmul.mubr.f32.vlgmr.msra.gmra.mrb[2].mxu1 %v1813_v58 }
 0x358   : > { %2465 = vmatpush3.msra.mxu1 %v1748_v6  ;;  %2466 = vmatprep.mubr.msk.f32.mxu1 %vm2686_vm0, %v2685_v1 }
 0x35f   : > { %2467 = vmatmul.mubr.f32.vlgmr.msra.gmra.mrb[2].mxu1 %v1813_v58 }
 0x432   : > { %v2189_v12 = vpop.f32.mrb[2].mxu1 }
 0x433   : > { %v2472_v13 = vadd.f32 %v2189_v12, %v1742_v11  ;;  %v2468_v14 = vpop.f32.mrb[3].mxu1 }
 0x435   : > { %2193 = vst [vmem:[%s347_s26] sm:$0xf] %v2472_v13 }
 0x436   : > { %2602 = shalt.err (!%p2599_p7)
}
 0x437   : > { %s2603_s1 = scalar_lea.hbm %s2922_s18, 64  ;;  %s2607_s29 = scalar_lea.hbm %s2984_s9, 256 }
 0x438   : > { %p2604_p9 = scmp.ne.s32.totalorder %s2922_s18, %s2603_s1  ;;  %p2608_p12 = scmp.lt.u32.totalorder %s2922_s18, %s2984_s9 }
 0x439   : > { %p2609_p13 = scmp.lt.u32.totalorder %s2607_s29, %s2603_s1  ;;  %p2611_p1 = scmp.lt.u32.totalorder %s2603_s1, %s2922_s18 }
 0x43a   : > { %p2605_p10 = pnand %p2604_p9, %p2790_p3 }
 0x43b   : > { %p2610_p0 = por %p2609_p13, %p2608_p12 }
 0x43c   : > { %p2606_p11 = pneg %p2605_p10 }
 0x43d   : > { %p2612_p2 = por %p2611_p1, %p2610_p0 }
 0x43f   : > { %p2613_p4 = pnand %p2612_p2, %p2606_p11 }
 0x441   : > { %2616 = shalt.err (!%p2613_p4)
}
 0x442   : > { %2513 = dma.vmem_to_hbm [thread:$0]  (%p2790_p3), %s2924_s28, 64, %s2922_s18, %s2195_s13  }
 0x443 PF: > { %p2519_p5 = scmp.ge.s32.totalorder %s2683_s16, 2  ;;  %s2222_s12 = sand.u32 1, %s2655_s30  }
 0x444   : > { %s2223_s21 = scalar_lea.sflag [#allocation3], %s2222_s12 }
 0x445   : > { %p2516_p6 = pnand %p2519_p5, %p2799_p8 }
 0x447   : > { %2650 = dma.done.wait (!%p2516_p6), %s2223_s21, 64  }
 0x448   : > { %2652 = vsyncadd (!%p2516_p6), %s2223_s21, 4294967232  ;;  %s22_s16 = sadd.s32 1, %s2683_s16   ;;  %s2991_s30 = smov %s2659_s10 }
 0x449   : > { %p19_p7 = scmp.ge.s32.totalorder %s22_s16, 6   ;;  %s2992_s10 = smov %s2663_s11 }
 0x44a   : > { %s2993_s11 = smov %s2808_s27  ;;  %s2994_s12 = smov %s2675_s14 }
 0x44b   : > { %s2995_s13 = smov %s2679_s15  ;;  %s2996_s14 = smov %s2999_s19 }
 0x44c   : > { %s2997_s15 = smov %s3003_s20  ;;  %21 = sbr.rel (!%p19_p7) target bundleno = 8 (0x8), region = 91 }
 0x453   :  { %2228 = vsyncpa [#allocation3], 1 }
 0x454   :  { %2230 = vsyncpa [#allocation3 + $0x1], 1 }

</bundles_post_ra>
